<compile_context>
chip_gen: v5e
topology: v5e:2x2
jax: 0.10.0
libtpu: 0.0.40
codegen_flags: <defaults>
</compile_context>

<pallas_src>
import jax
import jax.numpy as jnp
from jax import lax
from jax.experimental import pallas as pl
from jax.experimental.pallas import tpu as pltpu

VOCAB = 32128        # hardcoded by the PyTorch module's .view(-1, 32128)
T = 1.0              # self.T = 1; the algebraic collapse above requires T == 1
CHUNK = 2048         # in-kernel vocab chunk (multiple of 128 lanes)
_NFULL = (VOCAB // CHUNK) * CHUNK          # 30720 = 15 * 2048
_TAIL = VOCAB - _NFULL                     # 1408  = 11 * 128


def kl_kernel(ys_ref, yt_ref, loss_ref):
    tm = ys_ref.shape[0]
    f32 = jnp.float32

    def chunk_max(sl, m_s, m_t):
        # max in native dtype (exact); only the (tm,1) result is cast to f32.
        m_s = jnp.maximum(
            m_s, jnp.max(ys_ref[:, sl], axis=-1, keepdims=True).astype(f32))
        m_t = jnp.maximum(
            m_t, jnp.max(yt_ref[:, sl], axis=-1, keepdims=True).astype(f32))
        return m_s, m_t

    def chunk_sums(sl, m_s, m_t, se_s, z_t, dot):
        s_c = ys_ref[:, sl].astype(f32)            # (tm, chunk)
        t_c = yt_ref[:, sl].astype(f32)            # (tm, chunk)
        e_t = jnp.exp(t_c - m_t)                   # chunk-resident, used twice
        se_s = se_s + jnp.sum(jnp.exp(s_c - m_s), axis=-1, keepdims=True)
        z_t = z_t + jnp.sum(e_t, axis=-1, keepdims=True)
        dot = dot + jnp.sum(e_t * s_c, axis=-1, keepdims=True)
        return se_s, z_t, dot

    neg_inf = jnp.full((tm, 1), -jnp.inf, f32)
    zeros = jnp.zeros((tm, 1), f32)

    # ---- pass 1: per-row maxima (student + teacher), chunked over vocab ----
    def max_body(c, carry):
        start = pl.multiple_of(c * CHUNK, CHUNK)
        return chunk_max(pl.ds(start, CHUNK), *carry)

    m_s, m_t = lax.fori_loop(0, _NFULL // CHUNK, max_body, (neg_inf, neg_inf))
    if _TAIL:
        m_s, m_t = chunk_max(pl.ds(_NFULL, _TAIL), m_s, m_t)

    # ---- pass 2: row sums; exactly one exp per loaded element ----
    def sum_body(c, carry):
        start = pl.multiple_of(c * CHUNK, CHUNK)
        return chunk_sums(pl.ds(start, CHUNK), m_s, m_t, *carry)

    se_s, z_t, dot = lax.fori_loop(0, _NFULL // CHUNK, sum_body,
                                   (zeros, zeros, zeros))
    if _TAIL:
        se_s, z_t, dot = chunk_sums(pl.ds(_NFULL, _TAIL), m_s, m_t,
                                    se_s, z_t, dot)

    # loss_row = -sum(p_t * p_s) = m_s + lse_s - sum(e_t*s)/z_t   (exact, T==1)
    loss_ref[...] = m_s + jnp.log(se_s) - dot / z_t


def _round_up(x, m):
    return ((x + m - 1) // m) * m


def _pick_config():
    """Generation-specific (row tile, vmem limit): v5e/v6e 128 MiB, v7x 64 MiB/TC."""
    try:
        vmem = pltpu.get_tpu_info().vmem_capacity_bytes
    except Exception:
        vmem = 64 << 20  # conservative: assume v7x per-TC budget
    if vmem >= (128 << 20):
        return 128, 100 << 20      # v5e / v6e
    return 64, 52 << 20            # v7x


def kl_loss(y_s, y_t, *, tm=None, vmem_limit_bytes=None):
    """Classification-mode KL loss. y_s, y_t: any shape flattenable to (-1, 32128)."""
    assert T == 1.0, "kernel's algebraic collapse is only valid for T == 1"
    # TODO(synk): 'regression' mode (F.mse_loss on the log-softmax outputs) is
    # not implemented; only the default 'classification' branch is.
    y_s = y_s.reshape(-1, VOCAB)
    y_t = y_t.reshape(-1, VOCAB)
    n = y_s.shape[0]

    tm_auto, vmem_auto = _pick_config()
    if tm is None:
        tm = tm_auto
    if vmem_limit_bytes is None:
        vmem_limit_bytes = vmem_auto

    # Sublane granule: 16 for sub-32-bit dtypes (bf16 packing), 8 for f32.
    sub = 16 if y_s.dtype.itemsize < 4 else 8
    # For small batches, halve the tile so both v7x TensorCores get work.
    if n <= tm:
        tm = _round_up(max(1, (n + 1) // 2), sub)
    # Never make the tile (pointlessly) larger than the row count.
    tm = max(sub, min(tm, _round_up(n, sub)))

    grid = (pl.cdiv(n, tm),)

    # NOTE: the last row tile may be partial; its out-of-bounds rows read
    # unspecified data and produce garbage per-row losses that are discarded
    # by the masked writeback / the [:n] slice below.  Rows are independent,
    # so in-bounds rows are unaffected.
    row_losses = pl.pallas_call(
        kl_kernel,
        out_shape=jax.ShapeDtypeStruct((n, 1), jnp.float32),
        grid=grid,
        in_specs=[
            pl.BlockSpec((tm, VOCAB), lambda i: (i, 0)),
            pl.BlockSpec((tm, VOCAB), lambda i: (i, 0)),
        ],
        out_specs=pl.BlockSpec((tm, 1), lambda i: (i, 0)),
        compiler_params=pltpu.CompilerParams(
            dimension_semantics=("parallel",),   # shards row tiles across TCs
            vmem_limit_bytes=vmem_limit_bytes,
        ),
    )(y_s, y_t)

    # Mean over the real rows only (pad/OOB rows excluded).
    return jnp.mean(row_losses[:n, 0])


def kl_loss_ref(y_s, y_t):
    """Pure-JAX reference mirroring the PyTorch forward exactly."""
    y_s = y_s.reshape(-1, VOCAB).astype(jnp.float32)
    y_t = y_t.reshape(-1, VOCAB).astype(jnp.float32)
    y_s = jax.nn.log_softmax(y_s, axis=-1)
    y_t = jax.nn.log_softmax(y_t, axis=-1)
    p_s = jax.nn.log_softmax(y_s / T, axis=-1)
    p_t = jax.nn.softmax(y_t / T, axis=-1)
    return jnp.mean(-jnp.sum(p_t * p_s, axis=-1))


if __name__ == "__main__":
    key = jax.random.PRNGKey(0)
    k1, k2 = jax.random.split(key)
    # small logits batch: (batch=2, seq=4, vocab=32128) -> 8 rows of 32128
    y_s = jax.random.normal(k1, (2, 4, VOCAB), dtype=jnp.float32)
    y_t = jax.random.normal(k2, (2, 4, VOCAB), dtype=jnp.float32)

    loss = jax.block_until_ready(kl_loss(y_s, y_t))
    ref = jax.block_until_ready(kl_loss_ref(y_s, y_t))

    assert jnp.isfinite(loss), "kernel produced non-finite loss"
    assert jnp.allclose(loss, ref, rtol=1e-4, atol=1e-4), (loss, ref)
    print("KERNEL_OK")
</pallas_src>

<mosaic_0001>
module attributes {stable_mosaic.version = 11 : i64} {
  func.func @kl_kernel(%arg0: i32, %arg1: memref<8x32128xf32, #tpu.memory_space<vmem>>, %arg2: memref<8x32128xf32, #tpu.memory_space<vmem>>, %arg3: memref<8x1xf32, #tpu.memory_space<vmem>>) attributes {dimension_semantics = [#tpu.dimension_semantics<parallel>], iteration_bounds = array<i64: 1>, scalar_prefetch = 0 : i64, scratch_operands = 0 : i64, tpu.core_type = #tpu.core_type<tc>, window_params = [{transform_indices = @transform_0, window_bounds = array<i64: 8, 32128>}, {transform_indices = @transform_1, window_bounds = array<i64: 8, 32128>}, {transform_indices = @transform_2, window_bounds = array<i64: 8, 1>}]} {
    %cst = arith.constant 0xFF800000 : f32
    %0 = vector.broadcast %cst : f32 to vector<8x1xf32>
    %cst_0 = arith.constant 0.000000e+00 : f32
    %1 = vector.broadcast %cst_0 : f32 to vector<8x1xf32>
    %c0_i32 = arith.constant 0 : i32
    %c15_i32 = arith.constant 15 : i32
    %2 = arith.addi %c0_i32, %c15_i32 : i32
    %c1_i32 = arith.constant 1 : i32
    %3:2 = scf.for %arg4 = %c0_i32 to %2 step %c1_i32 iter_args(%arg5 = %0, %arg6 = %0) -> (vector<8x1xf32>, vector<8x1xf32>)  : i32 {
      %c2048_i32 = arith.constant 2048 : i32
      %37 = arith.muli %arg4, %c2048_i32 : i32
      %38 = tpu.assume_multiple %37, 2048 : i32
      %c0_19 = arith.constant 0 : index
      %39 = arith.index_cast %38 : i32 to index
      %40 = vector.load %arg1[%c0_19, %39] : memref<8x32128xf32, #tpu.memory_space<vmem>>, vector<8x2048xf32>
      %cst_20 = arith.constant dense<0xFF800000> : vector<8xf32>
      %41 = vector.multi_reduction <maximumf>, %40, %cst_20 [1] : vector<8x2048xf32> to vector<8xf32>
      %42 = vector.shape_cast %41 : vector<8xf32> to vector<8x1xf32>
      %43 = arith.maximumf %arg5, %42 : vector<8x1xf32>
      %c0_21 = arith.constant 0 : index
      %44 = arith.index_cast %38 : i32 to index
      %45 = vector.load %arg2[%c0_21, %44] : memref<8x32128xf32, #tpu.memory_space<vmem>>, vector<8x2048xf32>
      %cst_22 = arith.constant dense<0xFF800000> : vector<8xf32>
      %46 = vector.multi_reduction <maximumf>, %45, %cst_22 [1] : vector<8x2048xf32> to vector<8xf32>
      %47 = vector.shape_cast %46 : vector<8xf32> to vector<8x1xf32>
      %48 = arith.maximumf %arg6, %47 : vector<8x1xf32>
      scf.yield %43, %48 : vector<8x1xf32>, vector<8x1xf32>
    }
    %c15_i32_1 = arith.constant 15 : i32
    %c0 = arith.constant 0 : index
    %c30720 = arith.constant 30720 : index
    %4 = vector.load %arg1[%c0, %c30720] : memref<8x32128xf32, #tpu.memory_space<vmem>>, vector<8x1408xf32>
    %cst_2 = arith.constant dense<0xFF800000> : vector<8xf32>
    %5 = vector.multi_reduction <maximumf>, %4, %cst_2 [1] : vector<8x1408xf32> to vector<8xf32>
    %6 = vector.shape_cast %5 : vector<8xf32> to vector<8x1xf32>
    %7 = arith.maximumf %3#0, %6 : vector<8x1xf32>
    %c0_3 = arith.constant 0 : index
    %c30720_4 = arith.constant 30720 : index
    %8 = vector.load %arg2[%c0_3, %c30720_4] : memref<8x32128xf32, #tpu.memory_space<vmem>>, vector<8x1408xf32>
    %cst_5 = arith.constant dense<0xFF800000> : vector<8xf32>
    %9 = vector.multi_reduction <maximumf>, %8, %cst_5 [1] : vector<8x1408xf32> to vector<8xf32>
    %10 = vector.shape_cast %9 : vector<8xf32> to vector<8x1xf32>
    %11 = arith.maximumf %3#1, %10 : vector<8x1xf32>
    %c0_i32_6 = arith.constant 0 : i32
    %c15_i32_7 = arith.constant 15 : i32
    %12 = arith.addi %c0_i32_6, %c15_i32_7 : i32
    %c1_i32_8 = arith.constant 1 : i32
    %13:3 = scf.for %arg4 = %c0_i32_6 to %12 step %c1_i32_8 iter_args(%arg5 = %1, %arg6 = %1, %arg7 = %1) -> (vector<8x1xf32>, vector<8x1xf32>, vector<8x1xf32>)  : i32 {
      %c2048_i32 = arith.constant 2048 : i32
      %37 = arith.muli %arg4, %c2048_i32 : i32
      %38 = tpu.assume_multiple %37, 2048 : i32
      %c0_19 = arith.constant 0 : index
      %39 = arith.index_cast %38 : i32 to index
      %40 = vector.load %arg1[%c0_19, %39] : memref<8x32128xf32, #tpu.memory_space<vmem>>, vector<8x2048xf32>
      %c0_20 = arith.constant 0 : index
      %41 = arith.index_cast %38 : i32 to index
      %42 = vector.load %arg2[%c0_20, %41] : memref<8x32128xf32, #tpu.memory_space<vmem>>, vector<8x2048xf32>
      %43 = vector.broadcast %11 : vector<8x1xf32> to vector<8x2048xf32>
      %44 = arith.subf %42, %43 : vector<8x2048xf32>
      %45 = math.exp %44 : vector<8x2048xf32>
      %46 = vector.broadcast %7 : vector<8x1xf32> to vector<8x2048xf32>
      %47 = arith.subf %40, %46 : vector<8x2048xf32>
      %48 = math.exp %47 : vector<8x2048xf32>
      %cst_21 = arith.constant dense<0.000000e+00> : vector<8xf32>
      %49 = vector.multi_reduction <add>, %48, %cst_21 [1] : vector<8x2048xf32> to vector<8xf32>
      %50 = vector.shape_cast %49 : vector<8xf32> to vector<8x1xf32>
      %51 = arith.addf %arg5, %50 : vector<8x1xf32>
      %cst_22 = arith.constant dense<0.000000e+00> : vector<8xf32>
      %52 = vector.multi_reduction <add>, %45, %cst_22 [1] : vector<8x2048xf32> to vector<8xf32>
      %53 = vector.shape_cast %52 : vector<8xf32> to vector<8x1xf32>
      %54 = arith.addf %arg6, %53 : vector<8x1xf32>
      %55 = arith.mulf %45, %40 : vector<8x2048xf32>
      %cst_23 = arith.constant dense<0.000000e+00> : vector<8xf32>
      %56 = vector.multi_reduction <add>, %55, %cst_23 [1] : vector<8x2048xf32> to vector<8xf32>
      %57 = vector.shape_cast %56 : vector<8xf32> to vector<8x1xf32>
      %58 = arith.addf %arg7, %57 : vector<8x1xf32>
      scf.yield %51, %54, %58 : vector<8x1xf32>, vector<8x1xf32>, vector<8x1xf32>
    }
    %c15_i32_9 = arith.constant 15 : i32
    %c0_10 = arith.constant 0 : index
    %c30720_11 = arith.constant 30720 : index
    %14 = vector.load %arg1[%c0_10, %c30720_11] : memref<8x32128xf32, #tpu.memory_space<vmem>>, vector<8x1408xf32>
    %c0_12 = arith.constant 0 : index
    %c30720_13 = arith.constant 30720 : index
    %15 = vector.load %arg2[%c0_12, %c30720_13] : memref<8x32128xf32, #tpu.memory_space<vmem>>, vector<8x1408xf32>
    %16 = vector.broadcast %11 : vector<8x1xf32> to vector<8x1408xf32>
    %17 = arith.subf %15, %16 : vector<8x1408xf32>
    %18 = math.exp %17 : vector<8x1408xf32>
    %19 = vector.broadcast %7 : vector<8x1xf32> to vector<8x1408xf32>
    %20 = arith.subf %14, %19 : vector<8x1408xf32>
    %21 = math.exp %20 : vector<8x1408xf32>
    %cst_14 = arith.constant dense<0.000000e+00> : vector<8xf32>
    %22 = vector.multi_reduction <add>, %21, %cst_14 [1] : vector<8x1408xf32> to vector<8xf32>
    %23 = vector.shape_cast %22 : vector<8xf32> to vector<8x1xf32>
    %24 = arith.addf %13#0, %23 : vector<8x1xf32>
    %cst_15 = arith.constant dense<0.000000e+00> : vector<8xf32>
    %25 = vector.multi_reduction <add>, %18, %cst_15 [1] : vector<8x1408xf32> to vector<8xf32>
    %26 = vector.shape_cast %25 : vector<8xf32> to vector<8x1xf32>
    %27 = arith.addf %13#1, %26 : vector<8x1xf32>
    %28 = arith.mulf %18, %14 : vector<8x1408xf32>
    %cst_16 = arith.constant dense<0.000000e+00> : vector<8xf32>
    %29 = vector.multi_reduction <add>, %28, %cst_16 [1] : vector<8x1408xf32> to vector<8xf32>
    %30 = vector.shape_cast %29 : vector<8xf32> to vector<8x1xf32>
    %31 = arith.addf %13#2, %30 : vector<8x1xf32>
    %32 = math.log %24 : vector<8x1xf32>
    %33 = arith.addf %7, %32 : vector<8x1xf32>
    %34 = arith.divf %31, %27 : vector<8x1xf32>
    %35 = arith.subf %33, %34 : vector<8x1xf32>
    %c0_17 = arith.constant 0 : index
    %c0_18 = arith.constant 0 : index
    %36 = vector.load %arg3[%c0_17, %c0_18] : memref<8x1xf32, #tpu.memory_space<vmem>>, vector<8x1xf32>
    tpu.vector_store %arg3[%c0_17, %c0_18], %35 {strides = array<i32>} : memref<8x1xf32, #tpu.memory_space<vmem>>, vector<8x1xf32>,
    return
  }
  func.func @transform_0(%arg0: i32) -> (i32, i32) {
    %c0_i32 = arith.constant 0 : i32
    %c0_i32_0 = arith.constant 0 : i32
    return %arg0, %c0_i32 : i32, i32
  }
  func.func @transform_1(%arg0: i32) -> (i32, i32) {
    %c0_i32 = arith.constant 0 : i32
    %c0_i32_0 = arith.constant 0 : i32
    return %arg0, %c0_i32 : i32, i32
  }
  func.func @transform_2(%arg0: i32) -> (i32, i32) {
    %c0_i32 = arith.constant 0 : i32
    %c0_i32_0 = arith.constant 0 : i32
    return %arg0, %c0_i32 : i32, i32
  }
}

</mosaic_0001>

<bundles_post_ra>
// kernel: tpu_custom_call.1
= control target key start
LH: loop header
LB: loop body
LE: loop exit
PB: predicated region body
PF: predicated region fallthrough
CT: control target
= control target key end

     0   :  { %7 = vsyncpa [#allocation3], 0  ;;  %s1205_s0 = inlined_call_operand.hbm [shape: f32[8,32128], index: 0, kind: input, shape index: {}]   ;;  %s1206_s1 = inlined_call_operand.hbm [shape: f32[8,32128], index: 1, kind: input, shape index: {}]   ;;  %s1207_s2 = inlined_call_operand.vmem [shape: f32[8,1], index: 2, kind: output, shape index: {}]  }
   0x1   :  { %s14_s11 = sshll.u32 %s1205_s0, 4  ;;  %s15_s11 = int_to_ptr.hbm [resolvable:$true] %s14_s11 }
   0x2   :  { %8 = vsyncpa [#allocation5], 0  ;;  %s844_s12 = smov [#allocation2]   ;;  %s25_s16 = sshll.u32 %s1206_s1, 4  ;;  %s26_s16 = int_to_ptr.hbm [resolvable:$true] %s25_s16 }
   0x3   :  { %s16_s13 = sshll.u32 %s844_s12, 4  ;;  %s845_s17 = smov [#allocation4]   ;;  %s17_s13 = int_to_ptr.vmem [resolvable:$true] %s16_s13 }
   0x4   :  { %19 = dma.hbm_to_vmem [thread:$0]  %s15_s11, 32128, %s17_s13, [#allocation3]  }
   0x5   :  { %s27_s18 = sshll.u32 %s845_s17, 4  ;;  %s28_s18 = int_to_ptr.vmem [resolvable:$true] %s27_s18 }
   0x6   :  { %30 = dma.hbm_to_vmem [thread:$0]  %s26_s16, 32128, %s28_s18, [#allocation5]  }
   0x7   :  { %812 = dma.done.wait [#allocation3], 32128  }
   0x8   :  { %813 = vsyncadd [#allocation3], 4294935168 }
   0x9   :  { %814 = dma.done.wait [#allocation5], 32128  }
   0xa   :  { %815 = vsyncadd [#allocation5], 4294935168  ;;  %v867_v0 = vmov -inf   ;;  %v869_v1 = vmov -inf   ;;  %s871_s0 = smov 0  }
   0xb LB: > { %s560_s1 = sshll.u32 %s826_s0, 11  ;;  %s44_s0 = sadd.s32 1, %s826_s0   ;;  %s826_s0 = sphi %s871_s0, %s44_s0   ;;  %v822_v1 = vphi %v869_v1, %v1223_v1   ;;  %v818_v0 = vphi %v867_v0, %v1222_v0  }
   0xc   : > { %s48_s19 = sshra.s32 %s560_s1, 7  ;;  %p41_p0 = scmp.ge.s32.totalorder %s44_s0, 15  }
   0xd   : > { %s561_s20 = sshll.u32 %s48_s19, 3  ;;  %s968_s23 = smov (%p41_p0), 0  }
   0xe   : > { %s51_s21 = scalar_lea.vmem [#allocation2], %s561_s20  ;;  %s87_s22 = scalar_lea.vmem [#allocation4], %s561_s20 }
   0xf   : > { %v52_v2 = vld [vmem:[%s51_s21] sm:$0xff]  ;;  %v53_v3 = vld [vmem:[%s51_s21 + $0x8] sm:$0xff]  ;;  %v54_v4 = vld [vmem:[%s51_s21 + $0x10] sm:$0xff] }
  0x10   : > { %v55_v5 = vld [vmem:[%s51_s21 + $0x18] sm:$0xff]  ;;  %v56_v6 = vld [vmem:[%s51_s21 + $0x20] sm:$0xff]  ;;  %v57_v7 = vld [vmem:[%s51_s21 + $0x28] sm:$0xff] }
  0x11   : > { %v58_v8 = vld [vmem:[%s51_s21 + $0x30] sm:$0xff]  ;;  %v59_v9 = vld [vmem:[%s51_s21 + $0x38] sm:$0xff]  ;;  %v60_v10 = vld [vmem:[%s51_s21 + $0x40] sm:$0xff]  ;;  %v68_v11 = vmax.f32 %v52_v2, %v56_v6  ;;  %v69_v12 = vmax.f32 %v53_v3, %v57_v7 }
  0x12   : > { %v61_v13 = vld [vmem:[%s51_s21 + $0x48] sm:$0xff]  ;;  %v62_v14 = vld [vmem:[%s51_s21 + $0x50] sm:$0xff]  ;;  %v63_v15 = vld [vmem:[%s51_s21 + $0x58] sm:$0xff]  ;;  %v70_v16 = vmax.f32 %v54_v4, %v58_v8  ;;  %v71_v17 = vmax.f32 %v55_v5, %v59_v9 }
  0x13   : > { %v64_v18 = vld [vmem:[%s51_s21 + $0x60] sm:$0xff]  ;;  %v65_v19 = vld [vmem:[%s51_s21 + $0x68] sm:$0xff]  ;;  %v66_v20 = vld [vmem:[%s51_s21 + $0x70] sm:$0xff]  ;;  %v72_v21 = vmax.f32 %v68_v11, %v60_v10  ;;  %v73_v22 = vmax.f32 %v69_v12, %v61_v13 }
  0x14   : > { %v67_v23 = vld [vmem:[%s51_s21 + $0x78] sm:$0xff]  ;;  %v74_v24 = vmax.f32 %v70_v16, %v62_v14  ;;  %v75_v25 = vmax.f32 %v71_v17, %v63_v15  ;;  %v88_v26 = vld [vmem:[%s87_s22] sm:$0xff]  ;;  %v89_v27 = vld [vmem:[%s87_s22 + $0x8] sm:$0xff] }
  0x15   : > { %v76_v28 = vmax.f32 %v72_v21, %v64_v18  ;;  %v77_v29 = vmax.f32 %v73_v22, %v65_v19  ;;  %v90_v30 = vld [vmem:[%s87_s22 + $0x10] sm:$0xff]  ;;  %v91_v31 = vld [vmem:[%s87_s22 + $0x18] sm:$0xff]  ;;  %v92_v32 = vld [vmem:[%s87_s22 + $0x20] sm:$0xff] }
  0x16   : > { %v78_v33 = vmax.f32 %v74_v24, %v66_v20  ;;  %v79_v34 = vmax.f32 %v75_v25, %v67_v23  ;;  %v93_v35 = vld [vmem:[%s87_s22 + $0x28] sm:$0xff]  ;;  %v94_v36 = vld [vmem:[%s87_s22 + $0x30] sm:$0xff]  ;;  %v95_v37 = vld [vmem:[%s87_s22 + $0x38] sm:$0xff]  ;;  %v104_v38 = vmax.f32 %v88_v26, %v92_v32 }
  0x17   : > { %v80_v39 = vmax.f32 %v76_v28, %v77_v29  ;;  %v96_v40 = vld [vmem:[%s87_s22 + $0x40] sm:$0xff]  ;;  %v97_v41 = vld [vmem:[%s87_s22 + $0x48] sm:$0xff]  ;;  %v98_v42 = vld [vmem:[%s87_s22 + $0x50] sm:$0xff]  ;;  %v105_v43 = vmax.f32 %v89_v27, %v93_v35  ;;  %v106_v44 = vmax.f32 %v90_v30, %v94_v36  ;;  %v107_v45 = vmax.f32 %v91_v31, %v95_v37 }
  0x18   : > { %v81_v46 = vmax.f32 %v78_v33, %v79_v34  ;;  %v99_v47 = vld [vmem:[%s87_s22 + $0x58] sm:$0xff]  ;;  %v100_v48 = vld [vmem:[%s87_s22 + $0x60] sm:$0xff]  ;;  %v101_v49 = vld [vmem:[%s87_s22 + $0x68] sm:$0xff]  ;;  %v108_v50 = vmax.f32 %v104_v38, %v96_v40 }
  0x19   : > { %v102_v51 = vld [vmem:[%s87_s22 + $0x70] sm:$0xff]  ;;  %v103_v52 = vld [vmem:[%s87_s22 + $0x78] sm:$0xff]  ;;  %v109_v53 = vmax.f32 %v105_v43, %v97_v41  ;;  %v110_v54 = vmax.f32 %v106_v44, %v98_v42  ;;  %v111_v55 = vmax.f32 %v107_v45, %v99_v47  ;;  %v892_v6 = vld [vmem:[#allocation2 + $0x780] sm:$0xff] (%p41_p0) }
  0x1a   : > { %v82_v56 = vmax.f32 %v80_v39, %v81_v46  ;;  %v112_v57 = vmax.f32 %v108_v50, %v100_v48  ;;  %v894_v7 = vld [vmem:[#allocation2 + $0x788] sm:$0xff] (%p41_p0)  ;;  %v896_v8 = vld [vmem:[#allocation2 + $0x790] sm:$0xff] (%p41_p0)  ;;  %v900_v9 = vld [vmem:[#allocation2 + $0x7a0] sm:$0xff] (%p41_p0)  ;;  %v962_v50 = vmov (%p41_p0), 0.0  }
  0x1b   : > { %v113_v58 = vmax.f32 %v109_v53, %v101_v49  ;;  %v114_v59 = vmax.f32 %v110_v54, %v102_v51  ;;  %v115_v60 = vmax.f32 %v111_v55, %v103_v52  ;;  %1224 = vst [vmem:[#allocation8_spill] sm:$0xff] (%p41_p0), %v900_v9  ;;  %v902_v10 = vld [vmem:[#allocation2 + $0x7a8] sm:$0xff] (%p41_p0)  ;;  %v904_v11 = vld [vmem:[#allocation2 + $0x7b0] sm:$0xff] (%p41_p0)  ;;  %v906_v12 = vld [vmem:[#allocation2 + $0x7b8] sm:$0xff] (%p41_p0)  ;;  %v964_v51 = vmov (%p41_p0), 0.0  }
  0x1c   : > { %83 = vmax.xlane.f32.xlu0 %v82_v56  ;;  %1225 = vst [vmem:[#allocation9_spill] sm:$0xff] (%p41_p0), %v902_v10  ;;  %v908_v13 = vld [vmem:[#allocation2 + $0x7c0] sm:$0xff] (%p41_p0)  ;;  %v134_v14 = vmax.f32 (%p41_p0), %v894_v7, %v902_v10  ;;  %v914_v15 = vld [vmem:[#allocation2 + $0x7c8] sm:$0xff] (%p41_p0)  ;;  %v916_v16 = vld [vmem:[#allocation2 + $0x7d0] sm:$0xff] (%p41_p0)  ;;  %v135_v17 = vmax.f32 (%p41_p0), %v896_v8, %v904_v11  ;;  %v966_v52 = vmov (%p41_p0), 0.0  }
  0x1d   : > { %v116_v61 = vmax.f32 %v112_v57, %v113_v58  ;;  %v117_v62 = vmax.f32 %v114_v59, %v115_v60  ;;  %1226 = vst [vmem:[#allocation10_spill] sm:$0xff] (%p41_p0), %v904_v11  ;;  %v922_v19 = vld [vmem:[#allocation4 + $0x780] sm:$0xff] (%p41_p0)  ;;  %v926_v22 = vld [vmem:[#allocation4 + $0x788] sm:$0xff] (%p41_p0)  ;;  %v928_v23 = vld [vmem:[#allocation4 + $0x790] sm:$0xff] (%p41_p0) }
  0x1e   :  { %1227 = vst [vmem:[#allocation11_spill] sm:$0xff] (%p41_p0), %v906_v12  ;;  %v138_v21 = vmax.f32 (%p41_p0), %v134_v14, %v914_v15  ;;  %v930_v24 = vld [vmem:[#allocation4 + $0x798] sm:$0xff] (%p41_p0)  ;;  %v139_v25 = vmax.f32 (%p41_p0), %v135_v17, %v916_v16  ;;  %v933_v26 = vld [vmem:[#allocation4 + $0x7a0] sm:$0xff] (%p41_p0)  ;;  %v935_v27 = vld [vmem:[#allocation4 + $0x7a8] sm:$0xff] (%p41_p0) }
  0x1f   : > { %v118_v63 = vmax.f32 %v116_v61, %v117_v62  ;;  %1228 = vst [vmem:[#allocation12_spill] sm:$0xff] (%p41_p0), %v908_v13  ;;  %v937_v28 = vld [vmem:[#allocation4 + $0x7b0] sm:$0xff] (%p41_p0)  ;;  %v939_v30 = vld [vmem:[#allocation4 + $0x7b8] sm:$0xff] (%p41_p0)  ;;  %v941_v31 = vld [vmem:[#allocation4 + $0x7c0] sm:$0xff] (%p41_p0)  ;;  %v157_v33 = vmax.f32 (%p41_p0), %v922_v19, %v933_v26  ;;  %v158_v34 = vmax.f32 (%p41_p0), %v926_v22, %v935_v27 }
  0x20   :  { %1229 = vst [vmem:[#allocation13_spill] sm:$0xff] (%p41_p0), %v914_v15  ;;  %v943_v32 = vld [vmem:[#allocation4 + $0x7c8] sm:$0xff] (%p41_p0)  ;;  %v159_v35 = vmax.f32 (%p41_p0), %v928_v23, %v937_v28  ;;  %v951_v37 = vld [vmem:[#allocation4 + $0x7d0] sm:$0xff] (%p41_p0)  ;;  %v160_v38 = vmax.f32 (%p41_p0), %v930_v24, %v939_v30 }
  0x21   :  { %1230 = vst [vmem:[#allocation14_spill] sm:$0xff] (%p41_p0), %v916_v16  ;;  %v161_v39 = vmax.f32 (%p41_p0), %v157_v33, %v941_v31  ;;  %v162_v40 = vmax.f32 (%p41_p0), %v158_v34, %v943_v32 }
  0x22   :  { %v163_v41 = vmax.f32 (%p41_p0), %v159_v35, %v951_v37 }
  0x23   :  { %v164_v43 = vmax.f32 (%p41_p0), %v161_v39, %v162_v40 }
  0x24   : > { %119 = vmax.xlane.f32.xlu0 %v118_v63  ;;  %v165_v44 = vmax.f32 (%p41_p0), %v163_v41, %v160_v38 }
  0x26   :  { %v166_v45 = vmax.f32 (%p41_p0), %v164_v43, %v165_v44 }
  0x8f   : > { %v84_v2 = vpop.xlane.xlu0 %83 }
  0x90   : > { %v85_v3 = vmax.f32 %v822_v1, %v84_v2  }
  0x92   : > { %v1223_v1 = vmov %v85_v3 }
  0x93   :  { %v898_v1 = vld [vmem:[#allocation2 + $0x798] sm:$0xff] (%p41_p0) }
  0x94   :  { %v136_v18 = vmax.f32 (%p41_p0), %v898_v1, %v906_v12 }
  0x96   :  { %43 = sbr.rel (!%p41_p0) target bundleno = 11 (0xb), region = 54  ;;  %v141_v36 = vmax.f32 (%p41_p0), %v139_v25, %v136_v18 }
  0x97   : > { %v120_v4 = vpop.xlane.xlu0 %119 }
  0x98   : > { %v121_v5 = vmax.f32 %v818_v0, %v120_v4  }
  0x9a   : > { %v1222_v0 = vmov %v121_v5 }
  0x9b   :  { %v133_v0 = vmax.f32 %v892_v6, %v900_v9 }
  0x9d   :  { %v137_v20 = vmax.f32 %v133_v0, %v908_v13 }
  0x9f   :  { %v140_v29 = vmax.f32 %v137_v20, %v138_v21 }
  0xa1   :  { %v142_v42 = vmax.f32 %v140_v29, %v141_v36 }
  0xa3   :  { %143 = vmax.xlane.f32.xlu0 %v142_v42 }
  0xab   :  { %167 = vmax.xlane.f32.xlu0 %v166_v45 }
 0x116   :  { %v144_v46 = vpop.xlane.xlu0 %143 }
 0x117   :  { %v958_v47 = vmax.f32 %v85_v3, %v144_v46 }
 0x11e   :  { %v168_v48 = vpop.xlane.xlu0 %167 }
 0x11f   :  { %v960_v49 = vmax.f32 %v121_v5, %v168_v48 }
 0x120 LB: > { %s563_s24 = sshll.u32 %s842_s23, 11  ;;  %s175_s23 = sadd.s32 1, %s842_s23   ;;  %s842_s23 = sphi %s968_s23, %s175_s23   ;;  %v838_v52 = vphi %v966_v52, %v1236_v52   ;;  %v834_v51 = vphi %v964_v51, %v1235_v51   ;;  %v830_v50 = vphi %v962_v50, %v1234_v50  }
 0x121   : > { %s983_s25 = sshra.s32 %s563_s24, 7  ;;  %p172_p1 = scmp.ge.s32.totalorder %s175_s23, 15  }
 0x122   : > { %s564_s26 = sshll.u32 %s983_s25, 3  ;;  %vm519_vm4 = vcmask (%p172_p1), 7168  }
 0x123   : > { %s988_s27 = scalar_lea.vmem [#allocation2], %s564_s26  ;;  %s1053_s28 = scalar_lea.vmem [#allocation4], %s564_s26 }
 0x124   : > { %v991_v53 = vld [vmem:[%s988_s27] sm:$0xff]  ;;  %v994_v54 = vld [vmem:[%s988_s27 + $0x8] sm:$0xff]  ;;  %v997_v55 = vld [vmem:[%s988_s27 + $0x10] sm:$0xff] }
 0x125   : > { %v1000_v56 = vld [vmem:[%s988_s27 + $0x18] sm:$0xff]  ;;  %v1003_v57 = vld [vmem:[%s988_s27 + $0x20] sm:$0xff]  ;;  %v1006_v58 = vld [vmem:[%s988_s27 + $0x28] sm:$0xff]  ;;  %v266_v59 = vsub.f32 %v991_v53, %v958_v47  ;;  %v267_v60 = vsub.f32 %v994_v54, %v958_v47  ;;  %v268_v61 = vsub.f32 %v997_v55, %v958_v47 }
 0x126   : > { %v269_v62 = vsub.f32 %v1000_v56, %v958_v47  ;;  %v1017_v63 = vld [vmem:[%s988_s27 + $0x30] sm:$0xff]  ;;  %v270_v2 = vsub.f32 %v1003_v57, %v958_v47  ;;  %v271_v4 = vsub.f32 %v1006_v58, %v958_v47  ;;  %v1024_v0 = vld [vmem:[%s988_s27 + $0x38] sm:$0xff]  ;;  %v1027_v14 = vld [vmem:[%s988_s27 + $0x40] sm:$0xff] }
 0x127   : > { %v282_v3 = vmul.f32 1.442695, %v266_v59  ;;  %v284_v5 = vmul.f32 1.442695, %v267_v60  ;;  %v272_v17 = vsub.f32 %v1017_v63, %v958_v47  ;;  %v286_v18 = vmul.f32 1.442695, %v268_v61 }
 0x128   : > { %v288_v20 = vmul.f32 1.442695, %v269_v62  ;;  %v1032_v21 = vld [vmem:[%s988_s27 + $0x48] sm:$0xff]  ;;  %v290_v25 = vmul.f32 1.442695, %v270_v2  ;;  %v1035_v29 = vld [vmem:[%s988_s27 + $0x50] sm:$0xff]  ;;  %v273_v33 = vsub.f32 %v1024_v0, %v958_v47  ;;  %v274_v36 = vsub.f32 %v1027_v14, %v958_v47 }
 0x129   : > { %624 = vpow2.f32 %v282_v3  ;;  %v292_v34 = vmul.f32 1.442695, %v271_v4  ;;  %v1040_v35 = vld [vmem:[%s988_s27 + $0x58] sm:$0xff]  ;;  %v1045_v38 = vld [vmem:[%s988_s27 + $0x60] sm:$0xff]  ;;  %v275_v39 = vsub.f32 %v1032_v21, %v958_v47  ;;  %v294_v40 = vmul.f32 1.442695, %v272_v17 }
 0x12a   : > { %626 = vpow2.f32 %v284_v5  ;;  %v276_v42 = vsub.f32 %v1035_v29, %v958_v47  ;;  %v202_v43 = vld [vmem:[%s1053_s28] sm:$0xff]  ;;  %v277_v45 = vsub.f32 %v1040_v35, %v958_v47  ;;  %v296_v46 = vmul.f32 1.442695, %v273_v33  ;;  %v203_v48 = vld [vmem:[%s1053_s28 + $0x8] sm:$0xff]  ;;  %v204_v62 = vld [vmem:[%s1053_s28 + $0x10] sm:$0xff] }
 0x12b   : > { %628 = vpow2.f32 %v286_v18  ;;  %v278_v59 = vsub.f32 %v1045_v38, %v958_v47  ;;  %v298_v60 = vmul.f32 1.442695, %v274_v36  ;;  %v300_v3 = vmul.f32 1.442695, %v275_v39  ;;  %v205_v4 = vld [vmem:[%s1053_s28 + $0x18] sm:$0xff]  ;;  %v1069_v16 = vld [vmem:[%s988_s27 + $0x68] sm:$0xff] }
 0x12c   : > { %630 = vpow2.f32 %v288_v20  ;;  %v218_v5 = vsub.f32 %v202_v43, %v960_v49  ;;  %v302_v18 = vmul.f32 1.442695, %v276_v42  ;;  %v219_v33 = vsub.f32 %v203_v48, %v960_v49  ;;  %v212_v11 = vld [vmem:[%s1053_s28 + $0x50] sm:$0xff] }
 0x12d   : > { %632 = vpow2.f32 %v290_v25  ;;  %v206_v25 = vld [vmem:[%s1053_s28 + $0x20] sm:$0xff]  ;;  %v304_v36 = vmul.f32 1.442695, %v277_v45  ;;  %v306_v39 = vmul.f32 1.442695, %v278_v59  ;;  %v221_v42 = vsub.f32 %v205_v4, %v960_v49  ;;  %v209_v4 = vld [vmem:[%s1053_s28 + $0x38] sm:$0xff] }
 0x12e   : > { %634 = vpow2.f32 %v292_v34  ;;  %v222_v48 = vsub.f32 %v206_v25, %v960_v49 }
 0x12f   : > { %v625_v41 = vpop.eup %624  ;;  %636 = vpow2.f32 %v294_v40 }
 0x130   : > { %v627_v44 = vpop.eup %626  ;;  %638 = vpow2.f32 %v296_v46  ;;  %v1075_v46 = vld [vmem:[%s988_s27 + $0x70] sm:$0xff] }
 0x131   : > { %v314_v61 = vadd.f32 %v627_v44, %v625_v41  ;;  %v629_v2 = vpop.eup %628  ;;  %v207_v41 = vld [vmem:[%s1053_s28 + $0x28] sm:$0xff]  ;;  %v220_v44 = vsub.f32 %v204_v62, %v960_v49  ;;  %640 = vpow2.f32 %v298_v60  ;;  %v236_v60 = vmul.f32 1.442695, %v219_v33  ;;  %v210_v33 = vld [vmem:[%s1053_s28 + $0x40] sm:$0xff] }
 0x132   : > { %v631_v17 = vpop.eup %630  ;;  %642 = vpow2.f32 %v300_v3  ;;  %v223_v62 = vsub.f32 %v207_v41, %v960_v49  ;;  %v1082_v3 = vld [vmem:[%s988_s27 + $0x78] sm:$0xff]  ;;  %v242_v41 = vmul.f32 1.442695, %v222_v48 }
 0x133   : > { %v315_v20 = vadd.f32 %v629_v2, %v314_v61  ;;  %v633_v34 = vpop.eup %632  ;;  %v208_v61 = vld [vmem:[%s1053_s28 + $0x30] sm:$0xff]  ;;  %v234_v2 = vmul.f32 1.442695, %v218_v5  ;;  %644 = vpow2.f32 %v302_v18  ;;  %v240_v18 = vmul.f32 1.442695, %v221_v42 }
 0x134   : > { %v635_v43 = vpop.eup %634  ;;  %646 = vpow2.f32 %v304_v36  ;;  %v224_v5 = vsub.f32 %v208_v61, %v960_v49  ;;  %v244_v13 = vmul.f32 1.442695, %v223_v62  ;;  %v211_v61 = vld [vmem:[%s1053_s28 + $0x48] sm:$0xff] }
 0x135   : > { %v316_v40 = vadd.f32 %v631_v17, %v315_v20  ;;  %v637_v59 = vpop.eup %636  ;;  %v279_v17 = vsub.f32 %v1069_v16, %v958_v47  ;;  %v238_v20 = vmul.f32 1.442695, %v220_v44  ;;  %648 = vpow2.f32 %v306_v39 }
 0x136   : > { %v639_v15 = vpop.eup %638  ;;  %650 = vpow2.f32 %v234_v2  ;;  %v225_v44 = vsub.f32 %v209_v4, %v960_v49  ;;  %v226_v2 = vsub.f32 %v210_v33, %v960_v49  ;;  %v246_v48 = vmul.f32 1.442695, %v224_v5  ;;  %v213_v4 = vld [vmem:[%s1053_s28 + $0x58] sm:$0xff] }
 0x137   : > { %v317_v45 = vadd.f32 %v633_v34, %v316_v40  ;;  %v280_v34 = vsub.f32 %v1075_v46, %v958_v47  ;;  %v641_v40 = vpop.eup %640  ;;  %652 = vpow2.f32 %v236_v60  ;;  %v308_v42 = vmul.f32 1.442695, %v279_v17 }
 0x138   : > { %v643_v39 = vpop.eup %642  ;;  %654 = vpow2.f32 %v238_v20  ;;  %v227_v10 = vsub.f32 %v211_v61, %v960_v49  ;;  %v248_v17 = vmul.f32 1.442695, %v225_v44  ;;  %v250_v5 = vmul.f32 1.442695, %v226_v2  ;;  %v215_v61 = vld [vmem:[%s1053_s28 + $0x68] sm:$0xff] }
 0x139   : > { %v318_v25 = vadd.f32 %v635_v43, %v317_v45  ;;  %v281_v43 = vsub.f32 %v1082_v3, %v958_v47  ;;  %v645_v45 = vpop.eup %644  ;;  %656 = vpow2.f32 %v240_v18 }
 0x13a   : > { %658 = vpow2.f32 %v242_v41  ;;  %v229_v41 = vsub.f32 %v213_v4, %v960_v49  ;;  %v216_v4 = vld [vmem:[%s1053_s28 + $0x70] sm:$0xff] }
 0x13b   : > { %v319_v36 = vadd.f32 %v637_v59, %v318_v25  ;;  %v647_v59 = vpop.eup %646  ;;  %v310_v25 = vmul.f32 1.442695, %v280_v34  ;;  %660 = vpow2.f32 %v244_v13  ;;  %v312_v20 = vmul.f32 1.442695, %v281_v43 }
 0x13c   : > { %v649_v60 = vpop.eup %648  ;;  %662 = vpow2.f32 %v308_v42 }
 0x13d   : > { %v320_v12 = vadd.f32 %v639_v15, %v319_v36  ;;  %v651_v9 = vpop.eup %650  ;;  %v228_v15 = vsub.f32 %v212_v11, %v960_v49  ;;  %664 = vpow2.f32 %v246_v48  ;;  %v252_v11 = vmul.f32 1.442695, %v227_v10 }
 0x13e   : > { %v653_v36 = vpop.eup %652  ;;  %v350_v18 = vmul.f32 %v651_v9, %v991_v53  ;;  %666 = vpow2.f32 %v310_v25 }
 0x13f   : > { %v321_v62 = vadd.f32 %v641_v40, %v320_v12  ;;  %v655_v34 = vpop.eup %654  ;;  %v214_v12 = vld [vmem:[%s1053_s28 + $0x60] sm:$0xff]  ;;  %v351_v13 = vmul.f32 %v653_v36, %v994_v54  ;;  %v332_v40 = vadd.f32 %v653_v36, %v651_v9  ;;  %668 = vpow2.f32 %v248_v17 }
 0x140   : > { %v657_v44 = vpop.eup %656  ;;  %670 = vpow2.f32 %v312_v20  ;;  %v230_v54 = vsub.f32 %v214_v12, %v960_v49  ;;  %v254_v9 = vmul.f32 1.442695, %v228_v15 }
 0x141   : > { %v322_v33 = vadd.f32 %v643_v39, %v321_v62  ;;  %v352_v39 = vmul.f32 %v655_v34, %v997_v55  ;;  %v659_v43 = vpop.eup %658  ;;  %v353_v53 = vmul.f32 %v657_v44, %v1000_v56  ;;  %v366_v2 = vadd.f32 %v351_v13, %v350_v18 }
 0x142   : > { %v333_v48 = vadd.f32 %v655_v34, %v332_v40  ;;  %v661_v25 = vpop.eup %660  ;;  %672 = vpow2.f32 %v250_v5  ;;  %v354_v10 = vmul.f32 %v659_v43, %v1003_v57  ;;  %v256_v56 = vmul.f32 1.442695, %v229_v41  ;;  %v217_v34 = vld [vmem:[%s1053_s28 + $0x78] sm:$0xff] }
 0x143   : > { %v323_v42 = vadd.f32 %v645_v45, %v322_v33  ;;  %v663_v45 = vpop.eup %662  ;;  %v367_v17 = vadd.f32 %v366_v2, %v352_v39  ;;  %v231_v33 = vsub.f32 %v215_v61, %v960_v49  ;;  %674 = vpow2.f32 %v252_v11 }
 0x144   : > { %v334_v55 = vadd.f32 %v657_v44, %v333_v48  ;;  %v665_v36 = vpop.eup %664  ;;  %v232_v40 = vsub.f32 %v216_v4, %v960_v49  ;;  %676 = vpow2.f32 %v254_v9  ;;  %v258_v57 = vmul.f32 1.442695, %v230_v54 }
 0x145   : > { %v324_v62 = vadd.f32 %v647_v59, %v323_v42  ;;  %v667_v18 = vpop.eup %666  ;;  %v355_v59 = vmul.f32 %v661_v25, %v1006_v58  ;;  %v368_v13 = vadd.f32 %v367_v17, %v353_v53  ;;  %v356_v44 = vmul.f32 %v665_v36, %v1017_v63 }
 0x146   : > { %v335_v12 = vadd.f32 %v659_v43, %v334_v55  ;;  %v669_v5 = vpop.eup %668  ;;  %v233_v41 = vsub.f32 %v217_v34, %v960_v49  ;;  %678 = vpow2.f32 %v256_v56  ;;  %v260_v2 = vmul.f32 1.442695, %v231_v33 }
 0x147   : > { %v325_v20 = vadd.f32 %v649_v60, %v324_v62  ;;  %v671_v42 = vpop.eup %670  ;;  %v369_v60 = vadd.f32 %v368_v13, %v354_v10  ;;  %v357_v58 = vmul.f32 %v669_v5, %v1024_v0  ;;  %680 = vpow2.f32 %v258_v57 }
 0x148   : > { %v336_v39 = vadd.f32 %v661_v25, %v335_v12  ;;  %v673_v61 = vpop.eup %672  ;;  %v262_v9 = vmul.f32 1.442695, %v232_v40  ;;  %682 = vpow2.f32 %v260_v2  ;;  %v264_v25 = vmul.f32 1.442695, %v233_v41 }
 0x149   : > { %v326_v15 = vadd.f32 %v663_v45, %v325_v20  ;;  %v370_v43 = vadd.f32 %v369_v60, %v355_v59  ;;  %v675_v48 = vpop.eup %674  ;;  %v358_v54 = vmul.f32 %v673_v61, %v1027_v14 }
 0x14a   : > { %v337_v53 = vadd.f32 %v665_v36, %v336_v39  ;;  %v677_v4 = vpop.eup %676  ;;  %v359_v10 = vmul.f32 %v675_v48, %v1032_v21  ;;  %684 = vpow2.f32 %v262_v9  ;;  %v388_v9 = vsub.f32 (%p172_p1), %v933_v26, %v960_v49 }
 0x14b   : > { %v327_v11 = vadd.f32 %v667_v18, %v326_v15  ;;  %v371_v45 = vadd.f32 %v370_v43, %v356_v44  ;;  %v360_v0 = vmul.f32 %v677_v4, %v1035_v29  ;;  %686 = vpow2.f32 %v264_v25 }
 0x14c   : > { %v338_v63 = vadd.f32 %v669_v5, %v337_v53  ;;  %v679_v20 = vpop.eup %678  ;;  %v418_v25 = vsub.f32 (%p172_p1), %v894_v7, %v958_v47 }
 0x14d   : > { %v328_v62 = vadd.f32 %v671_v42, %v327_v11  ;;  %v372_v17 = vadd.f32 %v371_v45, %v357_v58  ;;  %v681_v56 = vpop.eup %680  ;;  %v361_v14 = vmul.f32 %v679_v20, %v1040_v35  ;;  %v389_v45 = vsub.f32 (%p172_p1), %v935_v27, %v960_v49 }
 0x14e   : > { %v339_v55 = vadd.f32 %v673_v61, %v338_v63  ;;  %v683_v59 = vpop.eup %682  ;;  %v362_v13 = vmul.f32 %v681_v56, %v1045_v38  ;;  %v417_v27 = vsub.f32 (%p172_p1), %v892_v6, %v958_v47 }
 0x14f   : > { %329 = vadd.xlane.f32.xlu0 %v328_v62  ;;  %v373_v36 = vadd.f32 %v372_v17, %v358_v54  ;;  %v363_v15 = vmul.f32 %v683_v59, %v1069_v16  ;;  %v387_v62 = vsub.f32 (%p172_p1), %v930_v24, %v960_v49  ;;  %v392_v24 = vsub.f32 (%p172_p1), %v941_v31, %v960_v49 }
 0x150   : > { %v340_v33 = vadd.f32 %v675_v48, %v339_v55  ;;  %v685_v21 = vpop.eup %684  ;;  %v386_v48 = vsub.f32 (%p172_p1), %v928_v23, %v960_v49  ;;  %v403_v23 = vmul.f32 (%p172_p1), 1.442695, %v388_v9  ;;  %v405_v26 = vmul.f32 (%p172_p1), 1.442695, %v389_v45 }
 0x151   : > { %v374_v18 = vadd.f32 %v373_v36, %v359_v10  ;;  %v687_v42 = vpop.eup %686  ;;  %v364_v29 = vmul.f32 %v685_v21, %v1075_v46  ;;  %v420_v10 = vsub.f32 (%p172_p1), %v898_v1, %v958_v47  ;;  %v393_v31 = vsub.f32 (%p172_p1), %v943_v32, %v960_v49  ;;  %v1237_v36 = vld [vmem:[#allocation8_spill] sm:$0xff] (%p172_p1) }
 0x152   : > { %v341_v34 = vadd.f32 %v677_v4, %v340_v33  ;;  %v365_v39 = vmul.f32 %v687_v42, %v1082_v3  ;;  %v385_v3 = vsub.f32 (%p172_p1), %v926_v22, %v960_v49  ;;  %v391_v22 = vsub.f32 (%p172_p1), %v939_v30, %v960_v49 }
 0x153   : > { %v375_v12 = vadd.f32 %v374_v18, %v360_v0  ;;  %v419_v30 = vsub.f32 (%p172_p1), %v896_v8, %v958_v47  ;;  %v411_v55 = vmul.f32 (%p172_p1), 1.442695, %v392_v24  ;;  %v394_v0 = vsub.f32 (%p172_p1), %v951_v37, %v960_v49 }
 0x154   : > { %v342_v5 = vadd.f32 %v679_v20, %v341_v34  ;;  %v397_v63 = vmul.f32 (%p172_p1), 1.442695, %v385_v3  ;;  %v421_v33 = vsub.f32 (%p172_p1), %v1237_v36, %v958_v47  ;;  %v1238_v34 = vld [vmem:[#allocation9_spill] sm:$0xff] (%p172_p1) }
 0x155   : > { %v376_v40 = vadd.f32 %v375_v12, %v361_v14  ;;  %v432_v32 = vmul.f32 (%p172_p1), 1.442695, %v419_v30 }
 0x156   : > { %v343_v57 = vadd.f32 %v681_v56, %v342_v5  ;;  %v428_v56 = vmul.f32 (%p172_p1), 1.442695, %v417_v27  ;;  %v434_v5 = vmul.f32 (%p172_p1), 1.442695, %v420_v10  ;;  %v1243_v27 = vld [vmem:[#allocation14_spill] sm:$0xff] (%p172_p1) }
 0x157   : > { %v377_v44 = vadd.f32 %v376_v40, %v362_v13  ;;  %v430_v13 = vmul.f32 (%p172_p1), 1.442695, %v418_v25 }
 0x158   : > { %v344_v60 = vadd.f32 %v683_v59, %v343_v57  ;;  %v422_v59 = vsub.f32 (%p172_p1), %v1238_v34, %v958_v47  ;;  %v413_v57 = vmul.f32 (%p172_p1), 1.442695, %v393_v31 }
 0x159   : > { %v378_v35 = vadd.f32 %v377_v44, %v363_v15  ;;  %v436_v44 = vmul.f32 (%p172_p1), 1.442695, %v421_v33 }
 0x15a   : > { %v345_v61 = vadd.f32 %v685_v21, %v344_v60 }
 0x15b   : > { %v379_v11 = vadd.f32 %v378_v35, %v364_v29 }
 0x15c   : > { %v346_v41 = vadd.f32 %v687_v42, %v345_v61  ;;  %v1239_v42 = vld [vmem:[#allocation10_spill] sm:$0xff] (%p172_p1) }
 0x15d   : > { %v380_v2 = vadd.f32 %v379_v11, %v365_v39  ;;  %v423_v29 = vsub.f32 (%p172_p1), %v1239_v42, %v958_v47  ;;  %v1240_v11 = vld [vmem:[#allocation11_spill] sm:$0xff] (%p172_p1) }
 0x15e   : > { %347 = vadd.xlane.f32.xlu0 %v346_v41  ;;  %v424_v41 = vsub.f32 (%p172_p1), %v1240_v11, %v958_v47 }
 0x15f   : > { %381 = vadd.xlane.f32.xlu1 %v380_v2 }
 0x1c2   : > { %v330_v38 = vpop.xlane.xlu0 %329 }
 0x1c3   : > { %v1123_v52 = vadd.f32 %v838_v52, %v330_v38  }
 0x1c5   : > { %v1231_v16 = vmov %v1123_v52 }
 0x1c6   : > { %v1236_v52 = vmov %v1231_v16 }
 0x1c7   :  { %v384_v52 = vsub.f32 (%p172_p1), %v922_v19, %v960_v49  ;;  %v390_v19 = vsub.f32 (%p172_p1), %v937_v28, %v960_v49  ;;  %v409_v28 = vmul.f32 (%p172_p1), 1.442695, %v391_v22 }
 0x1c9   :  { %v395_v54 = vmul.f32 (%p172_p1), 1.442695, %v384_v52  ;;  %v407_v4 = vmul.f32 (%p172_p1), 1.442695, %v390_v19  ;;  %v1241_v52 = vld [vmem:[#allocation12_spill] sm:$0xff] (%p172_p1) }
 0x1ca   :  { %v425_v3 = vsub.f32 (%p172_p1), %v1241_v52, %v958_v47 }
 0x1cb   :  { %688 = vpow2.f32 (%p172_p1), %v395_v54 }
 0x1cc   :  { %690 = vpow2.f32 (%p172_p1), %v397_v63  ;;  %v1242_v63 = vld [vmem:[#allocation13_spill] sm:$0xff] (%p172_p1)  ;;  %v444_v25 = vmul.f32 (%p172_p1), 1.442695, %v425_v3 }
 0x1d1   : > { %v348_v58 = vpop.xlane.xlu0 %347  ;;  %v689_v17 = vpop.eup (%p172_p1), %688 }
 0x1d2   : > { %v1126_v51 = vadd.f32 %v834_v51, %v348_v58   ;;  %v382_v46 = vpop.xlane.xlu1 %381  ;;  %174 = sbr.rel (!%p172_p1) target bundleno = 288 (0x120), region = 65  ;;  %v691_v20 = vpop.eup (%p172_p1), %690  ;;  %v476_v21 = vmul.f32 (%p172_p1), %v689_v17, %v892_v6  ;;  %v415_v6 = vmul.f32 (%p172_p1), 1.442695, %v394_v0 }
 0x1d3   : > { %v1129_v50 = vadd.f32 %v830_v50, %v382_v46   ;;  %v463_v18 = vadd.f32 (%p172_p1), %v691_v20, %v689_v17  ;;  %v477_v49 = vmul.f32 (%p172_p1), %v691_v20, %v894_v7  ;;  %v438_v7 = vmul.f32 (%p172_p1), 1.442695, %v422_v59 }
 0x1d4   : > { %v1232_v43 = vmov %v1126_v51 }
 0x1d5   : > { %v1233_v53 = vmov %v1129_v50  ;;  %v1235_v51 = vmov %v1232_v43  ;;  %v487_v35 = vadd.f32 (%p172_p1), %v477_v49, %v476_v21 }
 0x1d6   : > { %v1234_v50 = vmov %v1233_v53  ;;  %v401_v51 = vmul.f32 (%p172_p1), 1.442695, %v387_v62 }
 0x1d7   :  { %v399_v50 = vmul.f32 1.442695, %v386_v48 }
 0x1d9   :  { %692 = vpow2.f32 %v399_v50  ;;  %v426_v50 = vsub.f32 %v1242_v63, %v958_v47 }
 0x1da   :  { %694 = vpow2.f32 %v401_v51  ;;  %v442_v51 = vmul.f32 1.442695, %v424_v41 }
 0x1db   :  { %696 = vpow2.f32 %v403_v23  ;;  %v446_v20 = vmul.f32 1.442695, %v426_v50 }
 0x1dc   :  { %698 = vpow2.f32 %v405_v26 }
 0x1dd   :  { %700 = vpow2.f32 %v407_v4  ;;  %v427_v4 = vsub.f32 %v1243_v27, %v958_v47 }
 0x1de   :  { %702 = vpow2.f32 %v409_v28 }
 0x1df   :  { %v693_v14 = vpop.eup %692  ;;  %704 = vpow2.f32 %v411_v55 }
 0x1e0   :  { %v695_v12 = vpop.eup %694  ;;  %v464_v37 = vadd.f32 %v693_v14, %v463_v18  ;;  %v478_v15 = vmul.f32 %v693_v14, %v896_v8  ;;  %706 = vpow2.f32 %v428_v56 }
 0x1e1   :  { %v697_v40 = vpop.eup %696  ;;  %708 = vpow2.f32 %v430_v13  ;;  %v479_v39 = vmul.f32 %v695_v12, %v898_v1  ;;  %v440_v1 = vmul.f32 1.442695, %v423_v29 }
 0x1e2   :  { %v465_v60 = vadd.f32 %v695_v12, %v464_v37  ;;  %v699_v61 = vpop.eup %698  ;;  %710 = vpow2.f32 %v432_v32  ;;  %v480_v38 = vmul.f32 %v697_v40, %v1237_v36  ;;  %v488_v58 = vadd.f32 %v487_v35, %v478_v15 }
 0x1e3   :  { %v701_v8 = vpop.eup %700  ;;  %712 = vpow2.f32 %v434_v5  ;;  %v481_v9 = vmul.f32 %v699_v61, %v1238_v34  ;;  %v448_v34 = vmul.f32 1.442695, %v427_v4 }
 0x1e4   :  { %v466_v2 = vadd.f32 %v697_v40, %v465_v60  ;;  %v703_v46 = vpop.eup %702  ;;  %714 = vpow2.f32 %v413_v57  ;;  %v489_v54 = vadd.f32 %v488_v58, %v479_v39  ;;  %v482_v23 = vmul.f32 %v701_v8, %v1239_v42 }
 0x1e5   :  { %v705_v48 = vpop.eup %704  ;;  %716 = vpow2.f32 %v436_v44  ;;  %v483_v17 = vmul.f32 %v703_v46, %v1240_v11 }
 0x1e6   :  { %v467_v62 = vadd.f32 %v699_v61, %v466_v2  ;;  %v707_v45 = vpop.eup %706  ;;  %718 = vpow2.f32 %v415_v6  ;;  %v490_v24 = vadd.f32 %v489_v54, %v480_v38  ;;  %v484_v56 = vmul.f32 %v705_v48, %v1241_v52 }
 0x1e7   :  { %v709_v19 = vpop.eup %708  ;;  %720 = vpow2.f32 %v438_v7 }
 0x1e8   :  { %v468_v22 = vadd.f32 %v701_v8, %v467_v62  ;;  %v711_v26 = vpop.eup %710  ;;  %v450_v28 = vadd.f32 %v709_v19, %v707_v45  ;;  %722 = vpow2.f32 %v440_v1  ;;  %v491_v31 = vadd.f32 %v490_v24, %v481_v9 }
 0x1e9   :  { %v713_v30 = vpop.eup %712  ;;  %724 = vpow2.f32 %v442_v51 }
 0x1ea   :  { %v469_v10 = vadd.f32 %v703_v46, %v468_v22  ;;  %v715_v55 = vpop.eup %714  ;;  %v451_v0 = vadd.f32 %v711_v26, %v450_v28  ;;  %v492_v14 = vadd.f32 %v491_v31, %v482_v23  ;;  %726 = vpow2.f32 %v444_v25 }
 0x1eb   :  { %v717_v36 = vpop.eup %716  ;;  %v485_v32 = vmul.f32 %v715_v55, %v1242_v63  ;;  %728 = vpow2.f32 %v446_v20 }
 0x1ec   :  { %v470_v33 = vadd.f32 %v705_v48, %v469_v10  ;;  %v719_v18 = vpop.eup %718  ;;  %v452_v59 = vadd.f32 %v713_v30, %v451_v0  ;;  %v493_v5 = vadd.f32 %v492_v14, %v483_v17  ;;  %730 = vpow2.f32 %v448_v34 }
 0x1ed   :  { %v721_v13 = vpop.eup %720  ;;  %v486_v15 = vmul.f32 %v719_v18, %v1243_v27 }
 0x1ee   :  { %v471_v12 = vadd.f32 %v715_v55, %v470_v33  ;;  %v453_v21 = vadd.f32 %v717_v36, %v452_v59  ;;  %v723_v37 = vpop.eup %722  ;;  %v494_v40 = vadd.f32 %v493_v5, %v484_v56 }
 0x1ef   :  { %v725_v42 = vpop.eup %724 }
 0x1f0   :  { %v472_v49 = vadd.f32 %v719_v18, %v471_v12  ;;  %v454_v57 = vadd.f32 %v721_v13, %v453_v21  ;;  %v495_v29 = vadd.f32 %v494_v40, %v485_v32  ;;  %v727_v60 = vpop.eup %726 }
 0x1f1   :  { %v729_v61 = vpop.eup %728 }
 0x1f2   :  { %473 = vadd.xlane.f32.xlu0 %v472_v49  ;;  %v455_v44 = vadd.f32 %v723_v37, %v454_v57  ;;  %v496_v39 = vadd.f32 %v495_v29, %v486_v15  ;;  %v731_v11 = vpop.eup %730 }
 0x1f4   :  { %v456_v35 = vadd.f32 %v725_v42, %v455_v44  ;;  %497 = vadd.xlane.f32.xlu1 %v496_v39 }
 0x1f6   :  { %v457_v6 = vadd.f32 %v727_v60, %v456_v35 }
 0x1f8   :  { %v458_v41 = vadd.f32 %v729_v61, %v457_v6 }
 0x1fa   :  { %v459_v7 = vadd.f32 %v731_v11, %v458_v41 }
 0x1fc   :  { %460 = vadd.xlane.f32.xlu0 %v459_v7 }
 0x265   :  { %v474_v8 = vpop.xlane.xlu0 %473 }
 0x266   :  { %v475_v2 = vadd.f32 %v474_v8, %v1232_v43 }
 0x267   :  { %v498_v48 = vpop.xlane.xlu1 %497 }
 0x268   :  { %732 = vrcp.f32 %v475_v2  ;;  %v514_v1 = vand.u32 2147483648, %v475_v2  ;;  %v512_v9 = vand.u32 2147483647, %v475_v2  ;;  %vm508_vm1 = vweird.f32 %v475_v2 }
 0x269   :  { %v499_v45 = vadd.f32 %v498_v48, %v1233_v53 }
 0x26a   :  { %v515_v63 = vor.u32 1.1754944e-38, %v514_v1  ;;  %vm513_vm3 = vcmp.eq.f32.partialorder %v512_v9, 8.507059e+37 }
 0x26e   :  { %v733_v38 = vpop.eup %732 }
 0x26f   :  { %v504_v58 = vmul.f32 %v733_v38, %v475_v2  ;;  %v461_v46 = vpop.xlane.xlu0 %460  ;;  %vm509_vm0 = vweird.f32 %v733_v38 }
 0x270   :  { %v462_v52 = vadd.f32 %v461_v46, %v1231_v16  ;;  %vm510_vm2 = vmor %vm508_vm1, %vm509_vm0 }
 0x271   :  { %v505_v3 = vsub.f32 1.0, %v504_v58 }
 0x272   :  { %734 = vlog2.f32 %v462_v52 }
 0x273   :  { %v506_v62 = vmul.f32 %v733_v38, %v505_v3 }
 0x275   :  { %v507_v54 = vadd.f32 %v733_v38, %v506_v62 }
 0x277   :  { %v511_v43 = vsel %vm510_vm2, %v733_v38, %v507_v54 }
 0x278   :  { %v516_v50 = vsel %vm513_vm3, %v515_v63, %v511_v43  ;;  %v735_v51 = vpop.eup %734 }
 0x279   :  { %v501_v19 = vmul.f32 0.6931472, %v735_v51  ;;  %v517_v22 = vmul.f32 %v516_v50, %v499_v45 }
 0x27b   :  { %v502_v16 = vadd.f32 %v501_v19, %v958_v47 }
 0x27d   :  { %v518_v23 = vsub.f32 %v502_v16, %v517_v22 }
 0x27f   :  { %520 = vst.msk [vmem:[%s1207_s2] sm:$0xff] %vm519_vm4, %v518_v23 }
 0x280   :  { %525 = vsyncpa [#allocation3], 1 }
 0x281   :  { %526 = vsyncpa [#allocation5], 1 }

</bundles_post_ra>
